<compile_context>
chip_gen: v6e
topology: v6e:2x2x1
jax: 0.10.0
libtpu: 0.0.40
codegen_flags: <defaults>
</compile_context>

<pallas_src>
import functools

import jax
import jax.numpy as jnp
from jax.experimental import pallas as pl
from jax.experimental.pallas import tpu as pltpu


def _round_up(v, m):
    return (v + m - 1) // m * m


def _filter_loss_kernel(w_ref, d_ref, out_ref, *, inv_count):
    # w_ref:  (Cout, K)      weight matrix (resident across the grid)
    # d_ref:  (K, TILE_M)    difference patches, M lane-dense
    # out_ref:(1,)           scalar accumulator / result in SMEM
    j = pl.program_id(0)

    @pl.when(j == 0)
    def _init():
        out_ref[0] = 0.0

    # conv(x) - conv(y) == W @ (x - y) patches; the bias cancels in the difference.
    pd = jnp.dot(w_ref[...], d_ref[...], preferred_element_type=jnp.float32)
    out_ref[0] += jnp.sum(jnp.abs(pd))

    @pl.when(j == pl.num_programs(0) - 1)
    def _finalize():
        out_ref[0] = out_ref[0] * inv_count


def _diff_patches_km(x, y):
    # x, y: (N, C, H, W) NCHW.  Returns the stride-3 im2col of (x - y) laid out as
    # (K, M) = (C*3*3, N*Ho*Wo), with K ordered (c, kh, kw) to match PyTorch's
    # Conv2d OIHW weight layout.
    n, c, h, w = x.shape
    ho = (h - 3) // 3 + 1
    wo = (w - 3) // 3 + 1
    d = (x.astype(jnp.float32) - y.astype(jnp.float32))[:, :, : ho * 3, : wo * 3]
    d = d.reshape(n, c, ho, 3, wo, 3)
    d = d.transpose(1, 3, 5, 0, 2, 4)                 # (C, 3, 3, N, Ho, Wo)
    return d.reshape(c * 9, n * ho * wo), (n, c, ho, wo)


def filter_loss(x, y, weight, bias, *, tile_m=4096):
    """weight: (Cout, Cin, 3, 3) PyTorch OIHW; bias: (Cout,) (cancels in the L1)."""
    del bias  # exactly cancels in |conv(x) - conv(y)|
    cout = weight.shape[0]

    d_km, (n, _c, ho, wo) = _diff_patches_km(x, y)
    k, m = d_km.shape

    # Tile the M axis; pad with zero columns (contribute 0 to the sum).
    tile_m = min(tile_m, _round_up(m, 128))
    m_pad = _round_up(m, tile_m)
    if m_pad != m:
        d_km = jnp.pad(d_km, ((0, 0), (0, m_pad - m)))

    wm = weight.reshape(cout, k).astype(jnp.float32)   # (Cout, K)
    inv_count = 1.0 / float(n * cout * ho * wo)
    grid = (m_pad // tile_m,)

    cost = pl.CostEstimate(
        flops=2 * cout * k * m_pad + 2 * cout * m_pad,
        transcendentals=0,
        bytes_accessed=4 * (k * m_pad + cout * k + 1),
    )

    out = pl.pallas_call(
        functools.partial(_filter_loss_kernel, inv_count=inv_count),
        out_shape=jax.ShapeDtypeStruct((1,), jnp.float32),
        grid=grid,
        in_specs=[
            pl.BlockSpec((cout, k), lambda j: (0, 0)),    # small weight, resident
            pl.BlockSpec((k, tile_m), lambda j: (0, j)),  # streamed M tiles
        ],
        out_specs=pl.BlockSpec(memory_space=pltpu.MemorySpace.SMEM),
        compiler_params=pltpu.CompilerParams(
            dimension_semantics=("arbitrary",)),
        cost_estimate=cost,
    )(wm, d_km)
    return out[0]


def _reference_loss(x, y, weight, bias):
    # Pure-JAX reference (XLA conv, bias included exactly as the PyTorch module does).
    def conv(v):
        o = jax.lax.conv_general_dilated(
            v, weight, window_strides=(3, 3), padding="VALID",
            dimension_numbers=("NCHW", "OIHW", "NCHW"))
        return o + bias[None, :, None, None]
    return jnp.mean(jnp.abs(conv(x) - conv(y)))


if __name__ == "__main__":
    key = jax.random.PRNGKey(0)
    kx, ky, kb = jax.random.split(key, 3)

    n_colors = 4                                      # args.n_colors
    x = jax.random.normal(kx, (2, n_colors, 16, 16), dtype=jnp.float32)
    y = jax.random.normal(ky, (2, n_colors, 16, 16), dtype=jnp.float32)

    # Deterministic parameters per the module's __init__: every (out, in) 3x3 filter
    # is the Laplacian-like kernel; bias is Conv2d's default U(-1/sqrt(fan_in), ...)
    # init (it cancels in the L1 of the two conv outputs anyway).
    base = jnp.array([[1., 4., 1.], [4., -20., 4.], [1., 4., 1.]], jnp.float32)
    weight = jnp.broadcast_to(base, (n_colors, n_colors, 3, 3)).astype(jnp.float32)
    bound = 1.0 / (n_colors * 9) ** 0.5
    bias = jax.random.uniform(kb, (n_colors,), jnp.float32, -bound, bound)

    loss = jax.jit(filter_loss)(x, y, weight, bias)
    jax.block_until_ready(loss)

    ref = _reference_loss(x, y, weight, bias)
    assert jnp.allclose(loss, ref, rtol=1e-5, atol=1e-5), (loss, ref)

    print("KERNEL_OK")
</pallas_src>

<mosaic_0001>
module attributes {stable_mosaic.version = 11 : i64} {
  func.func @_filter_loss_kernel(%arg0: i32, %arg1: memref<4x36xf32, #tpu.memory_space<vmem>>, %arg2: memref<36x128xf32, #tpu.memory_space<vmem>>, %arg3: memref<1xf32, #tpu.memory_space<smem>>) attributes {dimension_semantics = [#tpu.dimension_semantics<arbitrary>], iteration_bounds = array<i64: 1>, scalar_prefetch = 0 : i64, scratch_operands = 0 : i64, tpu.core_type = #tpu.core_type<tc>, window_params = [{pipeline_mode = #tpu.pipeline_mode<synchronous>, transform_indices = @transform_0, window_bounds = array<i64: 4, 36>}, {transform_indices = @transform_1, window_bounds = array<i64: 36, 128>}, {transform_indices = @transform_2, window_bounds = array<i64: 1>}]} {
    %c0_i32 = arith.constant 0 : i32
    %0 = arith.cmpi eq, %arg0, %c0_i32 : i32
    %1 = arith.extui %0 : i1 to i32
    %c0_i32_0 = arith.constant 0 : i32
    %2 = arith.cmpi ne, %1, %c0_i32_0 : i32
    scf.if %2 {
      %cst_9 = arith.constant 0.000000e+00 : f32
      %c0_10 = arith.constant 0 : index
      %17 = memref.load %arg3[%c0_10] : memref<1xf32, #tpu.memory_space<smem>>
      memref.store %cst_9, %arg3[%c0_10] : memref<1xf32, #tpu.memory_space<smem>>
    } else {
    }
    %c0 = arith.constant 0 : index
    %c0_1 = arith.constant 0 : index
    %3 = vector.load %arg1[%c0, %c0_1] : memref<4x36xf32, #tpu.memory_space<vmem>>, vector<4x36xf32>
    %c0_2 = arith.constant 0 : index
    %c0_3 = arith.constant 0 : index
    %4 = vector.load %arg2[%c0_2, %c0_3] : memref<36x128xf32, #tpu.memory_space<vmem>>, vector<36x128xf32>
    %cst = arith.constant dense<0.000000e+00> : vector<4x128xf32>
    %5 = tpu.matmul %3, %4, %cst {dimension_numbers = #tpu.dot_dimension_numbers<[1], [0], [0], [1], [0, 0, 1, 1], [], []>} : vector<4x36xf32>, vector<36x128xf32>, vector<4x128xf32> -> vector<4x128xf32>
    %c0_4 = arith.constant 0 : index
    %6 = memref.load %arg3[%c0_4] : memref<1xf32, #tpu.memory_space<smem>>
    %7 = math.absf %5 : vector<4x128xf32>
    %8 = vector.shape_cast %7 : vector<4x128xf32> to vector<1x4x128xf32>
    %cst_5 = arith.constant dense<0.000000e+00> : vector<1xf32>
    %9 = vector.multi_reduction <add>, %8, %cst_5 [1, 2] : vector<1x4x128xf32> to vector<1xf32>
    %10 = vector.shape_cast %9 : vector<1xf32> to vector<1x1x1xf32>
    %11 = vector.extract %10[0, 0, 0] : f32 from vector<1x1x1xf32>
    %12 = arith.addf %6, %11 : f32
    %c0_6 = arith.constant 0 : index
    %13 = memref.load %arg3[%c0_6] : memref<1xf32, #tpu.memory_space<smem>>
    memref.store %12, %arg3[%c0_6] : memref<1xf32, #tpu.memory_space<smem>>
    %c0_i32_7 = arith.constant 0 : i32
    %14 = arith.cmpi eq, %arg0, %c0_i32_7 : i32
    %15 = arith.extui %14 : i1 to i32
    %c0_i32_8 = arith.constant 0 : i32
    %16 = arith.cmpi ne, %15, %c0_i32_8 : i32
    scf.if %16 {
      %c0_9 = arith.constant 0 : index
      %17 = memref.load %arg3[%c0_9] : memref<1xf32, #tpu.memory_space<smem>>
      %cst_10 = arith.constant 5.000000e-03 : f32
      %18 = arith.mulf %17, %cst_10 : f32
      %c0_11 = arith.constant 0 : index
      %19 = memref.load %arg3[%c0_11] : memref<1xf32, #tpu.memory_space<smem>>
      memref.store %18, %arg3[%c0_11] : memref<1xf32, #tpu.memory_space<smem>>
    } else {
    }
    return
  }
  func.func @transform_0(%arg0: i32) -> (i32, i32) {
    %c0_i32 = arith.constant 0 : i32
    %c0_i32_0 = arith.constant 0 : i32
    %c0_i32_1 = arith.constant 0 : i32
    return %c0_i32, %c0_i32_0 : i32, i32
  }
  func.func @transform_1(%arg0: i32) -> (i32, i32) {
    %c0_i32 = arith.constant 0 : i32
    %c0_i32_0 = arith.constant 0 : i32
    return %c0_i32, %arg0 : i32, i32
  }
  func.func @transform_2(%arg0: i32) -> i32 {
    %c0_i32 = arith.constant 0 : i32
    %c0_i32_0 = arith.constant 0 : i32
    return %c0_i32 : i32
  }
}

</mosaic_0001>

<bundles_post_ra>
// kernel: filter_loss.1
= control target key start
LH: loop header
LB: loop body
LE: loop exit
PB: predicated region body
PF: predicated region fallthrough
CT: control target
= control target key end

     0   :  { %vm28_vm0 = vcmask 1043456   ;;  %v173_v1 = vmov 0.0   ;;  %vm174_vm1 = vmmov 0   ;;  %s214_s0 = inlined_call_operand.vmem [shape: f32[4,36], index: 0, kind: input, shape index: {}]   ;;  %s215_s1 = inlined_call_operand.vmem [shape: f32[36,128], index: 1, kind: input, shape index: {}]   ;;  %s216_s2 = inlined_call_operand.hbm [shape: f32[1], index: 2, kind: output, shape index: {}]  }
   0x1   :  { %v23_v0 = vld [vmem:[%s215_s1 + $0x20] sm:$0xf]  ;;  %144 = vmatprep.subr.mxu0 %v173_v1  ;;  %v22_v2 = vld [vmem:[%s215_s1 + $0x18] sm:$0xff]  ;;  %154 = vmatprep.mubr.msk.f32.mxu0 %vm174_vm1, %v173_v1 }
   0x2   :  { %145 = vmatpush3.msk.msra.mxu0 %vm28_vm0, %v23_v0 }
   0x3   :  { %7 = vsyncpa [#allocation3], 0  ;;  %146 = vmatprep.subr.mxu0 %v173_v1  ;;  %v21_v3 = vld [vmem:[%s215_s1 + $0x10] sm:$0xff]  ;;  %v20_v4 = vld [vmem:[%s215_s1 + $0x8] sm:$0xff]  ;;  %vm24_vm2 = vcmask 293888   ;;  %s175_s21 = smov [#allocation2]  }
   0x4   :  { %147 = vmatpush3.msra.mxu0 %v22_v2  ;;  %v19_v5 = vld [vmem:[%s215_s1] sm:$0xff] }
   0x5   :  { %148 = vmatprep.subr.mxu0 %v173_v1  ;;  %v18_v6 = vld [vmem:[%s214_s0] sm:$0xf] }
   0x6   :  { %149 = vmatpush3.msra.mxu0 %v21_v3 }
   0x7   :  { %150 = vmatprep.subr.mxu0 %v173_v1 }
   0x8   :  { %151 = vmatpush3.msra.mxu0 %v20_v4 }
   0x9   :  { %152 = vmatprep.subr.mxu0 %v173_v1 }
   0xa   :  { %153 = vmatpush3.msra.mxu0 %v19_v5 }
   0xb   :  { %155 = vmatmul.mubr.msk.f32.vlgmr.msra.gmra.mxu0 %vm24_vm2, %v18_v6 }
  0xcb   :  { %v98_v7 = vpop.f32.mrf.mxu0 }
  0xcc   :  { %v103_v8 = vand.u32 2147483647, %v98_v7 }
  0xcd   :  { %v156_v9 = vpop.f32.mrf.mxu0 }
  0xce   :  { %v104_v10 = vsel %vm28_vm0, %v103_v8, 0.0 }
  0xcf   :  { %105 = vadd.xlane.f32.xlu0 %v104_v10 }
 0x158   :  { %v106_v11 = vpop.xlane.xlu0 %105 }
 0x159   :  { %v107_v12 = vrot.slane %v106_v11, 4 }
 0x15b   :  { %v108_v13 = vadd.f32 %v107_v12, %v106_v11 }
 0x15d   :  { %v109_v14 = vrot.slane %v108_v13, 2 }
 0x15f   :  { %v110_v15 = vadd.f32 %v109_v14, %v108_v13 }
 0x161   :  { %v111_v16 = vrot.slane %v110_v15, 1 }
 0x163   :  { %v112_v17 = vadd.f32 %v111_v16, %v110_v15 }
 0x165   :  { %157 = vpush %v112_v17 }
 0x196   :  { %s158_s1 = spop %157 }
 0x197   :  { %s121_s0 = smul.f32 0.005, %s158_s1 }
 0x199   :  { %122 = sst [smem:[#allocation2]] %s121_s0 }
 0x19a   :  { %130 = dma.smem_to_hbm %s175_s21, 16, %s216_s2, [#allocation3]  }
 0x19b   :  { %171 = dma.done.wait [#allocation3], 16  }
 0x19c   :  { %172 = vsyncadd [#allocation3], 4294967280 }
 0x19d   :  { %134 = sfence }
 0x19e   :  { %135 = vsyncpa [#allocation3], 1 }

</bundles_post_ra>
